<compile_context>
chip_gen: v7x
topology: tpu7x:2x2x1
jax: 0.10.0
libtpu: 0.0.40
codegen_flags: <defaults>
</compile_context>

<pallas_src>
import functools

import jax
import jax.numpy as jnp
from jax.experimental import pallas as pl
from jax.experimental.pallas import tpu as pltpu


# ----------------------------------------------------------------------------
# Fused encoder kernel (one batch element per grid step)
# ----------------------------------------------------------------------------
def _make_encoder_kernel(*, block_meta, K, T, C, a, Lp, p_max):
    """Builds the fused encoder kernel body.

    Ref order: x, [w1, b1, w2, b2, (wres, bres)?] per block, whead, bhead,
               out, pad_scratch.
    block_meta: tuple of (has_downsample, dilation) per TemporalBlock.
    """

    def kernel(*refs):
        it = iter(refs)
        x_ref = next(it)
        block_refs = []
        for has_ds, d in block_meta:
            w1 = next(it)
            b1 = next(it)
            w2 = next(it)
            b2 = next(it)
            wres = next(it) if has_ds else None
            bres = next(it) if has_ds else None
            block_refs.append((w1, b1, w2, b2, wres, bres, d))
        whead_ref = next(it)
        bhead_ref = next(it)
        out_ref = next(it)
        pad_ref = next(it)

        # Zero only the causal-pad rows; the data rows are always overwritten
        # before they are read.  (Done every step: with "parallel" semantics
        # each core has its own scratch, so a program_id==0 guard is unsafe.)
        if p_max > 0:
            pad_ref[0:p_max, :] = jnp.zeros((p_max, C), jnp.float32)

        def causal_conv(hin, w_ref, b_ref, d):
            # hin: (T, C) value.  Dilated causal conv, f32 MXU accumulation.
            pad_ref[p_max:p_max + T, :] = hin
            acc = None
            for j in range(K):
                start = p_max - (K - 1 - j) * d          # static python int
                tap = pad_ref[start:start + T, :]        # (T, C)
                part = jnp.dot(tap, w_ref[j],
                               preferred_element_type=jnp.float32)
                acc = part if acc is None else acc + part
            return acc + b_ref[...]

        h = x_ref[...]                                   # (T, C) float32
        for w1, b1, w2, b2, wres, bres, d in block_refs:
            h1 = jnp.maximum(causal_conv(h, w1, b1, d), 0.0)
            h2 = causal_conv(h1, w2, b2, d)
            if wres is not None:                         # 1x1 downsample conv
                res = jnp.dot(h, wres[...],
                              preferred_element_type=jnp.float32) + bres[...]
            else:                                        # identity residual
                res = h
            h = jnp.maximum(h2 + res, 0.0)

        # AvgPool1d(a) + PyTorch (C, L') flatten + fused [mu | log_var] heads.
        # The 1/a scale and the flatten reordering are folded into whead.
        pad_ref[p_max:p_max + T, :] = h
        ones_row = jnp.full((1, a), 1.0, dtype=jnp.float32)   # hoisted constant
        acc = bhead_ref[...]                                  # (1, 2*latent)
        for l in range(Lp):
            win = pad_ref[p_max + l * a: p_max + (l + 1) * a, :]   # (a, C)
            pooled = jnp.dot(ones_row, win,
                             preferred_element_type=jnp.float32)   # (1, C)
            acc = acc + jnp.dot(pooled, whead_ref[l],
                                preferred_element_type=jnp.float32)
        out_ref[...] = acc                                     # (1, 2*latent)

    return kernel


# ----------------------------------------------------------------------------
# Wrapper: one pallas_call for the whole encoder
# ----------------------------------------------------------------------------
def tcn_encoder_forward(kernel_params, x, labels):
    """x: (B, C0, T), labels: (B, 1, T)  (PyTorch NCL layout). Returns (mu, log_var)."""
    meta = kernel_params["meta"]
    K, C, a, Lp = meta["K"], meta["C"], meta["a"], meta["Lp"]
    p_max, latent_dim = meta["p_max"], meta["latent_dim"]
    block_meta = meta["block_meta"]

    x_label = jnp.concatenate([x, labels], axis=1)              # (B, C0+1, T)
    h = jnp.transpose(x_label, (0, 2, 1)).astype(jnp.float32)   # (B, T, Cin0)
    B, T, cin0 = h.shape
    assert T == a * Lp, "input seq_len must match the one used at prep time"
    if cin0 < C:                                                # pad channels
        h = jnp.pad(h, ((0, 0), (0, 0), (0, C - cin0)))

    weights = kernel_params["flat"]

    def _rep_spec(arr):
        n = arr.ndim

        def imap(b):
            return (0,) * n

        return pl.BlockSpec(arr.shape, imap)

    in_specs = [pl.BlockSpec((None, T, C), lambda b: (b, 0, 0))]
    in_specs += [_rep_spec(w) for w in weights]

    kernel = _make_encoder_kernel(block_meta=block_meta, K=K, T=T, C=C,
                                  a=a, Lp=Lp, p_max=p_max)
    out = pl.pallas_call(
        kernel,
        out_shape=jax.ShapeDtypeStruct((B, 1, 2 * latent_dim), jnp.float32),
        grid=(B,),
        in_specs=in_specs,
        out_specs=pl.BlockSpec((None, 1, 2 * latent_dim), lambda b: (b, 0, 0)),
        scratch_shapes=[pltpu.VMEM((p_max + T, C), jnp.float32)],
        compiler_params=pltpu.CompilerParams(dimension_semantics=("parallel",)),
    )(h, *weights)

    mu = out[:, 0, :latent_dim]
    log_var = out[:, 0, latent_dim:]
    return mu, log_var


# ----------------------------------------------------------------------------
# One-time parameter preparation (padding, tap layout, fused/permuted head)
# ----------------------------------------------------------------------------
def prepare_kernel_params(params, *, inital_channels, latent_channels,
                          latent_dim, kernel_size, avgpoolnum, seq_len):
    cin0 = inital_channels + 1
    C = max(latent_channels, cin0)      # single channel width for the whole TCN
    K = kernel_size
    a = avgpoolnum
    Lp = seq_len // a

    flat = []
    block_meta = []
    p_max = 0
    for blk in params["blocks"]:
        d = int(blk["dilation"])
        p_max = max(p_max, (K - 1) * d)
        w1, b1, w2, b2 = blk["w1"], blk["b1"], blk["w2"], blk["b2"]
        cin, cout = w1.shape[1], w1.shape[2]
        # zero-padding extra channel rows/cols keeps the math exact
        flat.append(jnp.pad(w1, ((0, 0), (0, C - cin), (0, C - cout))))
        flat.append(jnp.pad(b1, ((0, 0), (0, C - cout))))
        flat.append(jnp.pad(w2, ((0, 0), (0, C - cout), (0, C - cout))))
        flat.append(jnp.pad(b2, ((0, 0), (0, C - cout))))
        has_ds = "wres" in blk
        if has_ds:
            flat.append(jnp.pad(blk["wres"], ((0, C - cin), (0, C - cout))))
            flat.append(jnp.pad(blk["bres"], ((0, 0), (0, C - cout))))
        block_meta.append((has_ds, d))

    # Fused [mu | log_var] head: fold in the AvgPool1d 1/a scale, the PyTorch
    # flatten ordering flat[c*Lp + l] -> our channels-last pooled[l, c] order,
    # and zero rows for padded channels.
    wfused = jnp.concatenate([params["wmu"], params["wlv"]], axis=1)   # (lc*Lp, 2L)
    whead = jnp.transpose(
        wfused.reshape(latent_channels, Lp, 2 * latent_dim), (1, 0, 2)) / a
    whead = jnp.pad(whead, ((0, 0), (0, C - latent_channels), (0, 0)))  # (Lp, C, 2L)
    bhead = jnp.concatenate([params["bmu"], params["blv"]], axis=1)     # (1, 2L)
    flat += [whead, bhead]

    meta = dict(K=K, C=C, a=a, Lp=Lp, p_max=p_max, latent_dim=latent_dim,
                block_meta=tuple(block_meta))
    return dict(flat=flat, meta=meta)


# ----------------------------------------------------------------------------
# Pure-JAX reference (same math, no Pallas) for a correctness check
# ----------------------------------------------------------------------------
def reference_forward(params, x, labels, *, avgpoolnum):
    xl = jnp.concatenate([x, labels], axis=1)
    h = jnp.transpose(xl, (0, 2, 1)).astype(jnp.float32)
    for blk in params["blocks"]:
        K = blk["w1"].shape[0]
        d = blk["dilation"]
        T = h.shape[1]
        p = (K - 1) * d
        xpad = jnp.pad(h, ((0, 0), (p, 0), (0, 0)))
        acc1 = sum(jnp.einsum("btc,cd->btd", xpad[:, j * d:j * d + T, :],
                              blk["w1"][j]) for j in range(K))
        h1 = jnp.maximum(acc1 + blk["b1"], 0.0)
        h1pad = jnp.pad(h1, ((0, 0), (p, 0), (0, 0)))
        acc2 = sum(jnp.einsum("btc,cd->btd", h1pad[:, j * d:j * d + T, :],
                              blk["w2"][j]) for j in range(K))
        h2 = acc2 + blk["b2"]
        if "wres" in blk:
            res = jnp.einsum("btc,cd->btd", h, blk["wres"]) + blk["bres"]
        else:
            res = h
        h = jnp.maximum(h2 + res, 0.0)
    B, T, C = h.shape
    pooled = jnp.transpose(h, (0, 2, 1)).reshape(B, C, T // avgpoolnum,
                                                 avgpoolnum).mean(-1)
    flat = pooled.reshape(B, C * (T // avgpoolnum))
    mu = flat @ params["wmu"] + params["bmu"]
    lv = flat @ params["wlv"] + params["blv"]
    return mu, lv


# ----------------------------------------------------------------------------
# Deterministic synthetic parameters (shapes per the module's __init__)
# ----------------------------------------------------------------------------
def init_params(key, *, inital_channels, latent_channels, latent_dim,
                kernel_size, dilatation, nb_blocks, avgpoolnum, seq_len):
    channels = inital_channels + 1
    dense_dim = latent_channels * seq_len // avgpoolnum
    blocks = []
    for i in range(nb_blocks):
        cin = channels if i == 0 else latent_channels
        d = dilatation ** i
        key, k1, k2, k3, k4, k5, k6 = jax.random.split(key, 7)
        blk = dict(
            w1=0.2 * jax.random.normal(k1, (kernel_size, cin, latent_channels), jnp.float32),
            b1=0.1 * jax.random.normal(k2, (1, latent_channels), jnp.float32),
            w2=0.2 * jax.random.normal(k3, (kernel_size, latent_channels, latent_channels), jnp.float32),
            b2=0.1 * jax.random.normal(k4, (1, latent_channels), jnp.float32),
            dilation=d,
        )
        if cin != latent_channels:  # downsample 1x1 conv on the residual path
            blk["wres"] = 0.2 * jax.random.normal(k5, (cin, latent_channels), jnp.float32)
            blk["bres"] = 0.1 * jax.random.normal(k6, (1, latent_channels), jnp.float32)
        blocks.append(blk)
    key, ka, kb, kc, kd = jax.random.split(key, 5)
    return dict(
        blocks=blocks,
        wmu=0.1 * jax.random.normal(ka, (dense_dim, latent_dim), jnp.float32),
        bmu=0.1 * jax.random.normal(kb, (1, latent_dim), jnp.float32),
        wlv=0.1 * jax.random.normal(kc, (dense_dim, latent_dim), jnp.float32),
        blv=0.1 * jax.random.normal(kd, (1, latent_dim), jnp.float32),
    )


# ----------------------------------------------------------------------------
if __name__ == "__main__":
    # Module hyper-parameters (small, consistent with the forward pass)
    inital_channels = 3
    latent_channels = 8
    latent_dim = 16
    kernel_size = 3
    dilatation = 2
    nb_blocks = 2
    avgpoolnum = 4
    seq_len = 16
    batch = 2

    key = jax.random.PRNGKey(0)
    kp, kx, kl = jax.random.split(key, 3)
    params = init_params(kp, inital_channels=inital_channels,
                         latent_channels=latent_channels, latent_dim=latent_dim,
                         kernel_size=kernel_size, dilatation=dilatation,
                         nb_blocks=nb_blocks, avgpoolnum=avgpoolnum,
                         seq_len=seq_len)
    kparams = prepare_kernel_params(params, inital_channels=inital_channels,
                                    latent_channels=latent_channels,
                                    latent_dim=latent_dim,
                                    kernel_size=kernel_size,
                                    avgpoolnum=avgpoolnum, seq_len=seq_len)

    x = jax.random.normal(kx, (batch, inital_channels, seq_len), jnp.float32)
    labels = jax.random.normal(kl, (batch, 1, seq_len), jnp.float32)

    fwd = jax.jit(functools.partial(tcn_encoder_forward, kparams))
    mu, log_var = fwd(x, labels)
    jax.block_until_ready((mu, log_var))

    mu_ref, lv_ref = reference_forward(params, x, labels, avgpoolnum=avgpoolnum)
    assert mu.shape == (batch, latent_dim) and log_var.shape == (batch, latent_dim)
    assert jnp.allclose(mu, mu_ref, rtol=1e-4, atol=1e-4)
    assert jnp.allclose(log_var, lv_ref, rtol=1e-4, atol=1e-4)

    print("KERNEL_OK")
</pallas_src>

<mosaic_0001>
module attributes {stable_mosaic.version = 11 : i64} {
  func.func @kernel(%arg0: i32, %arg1: memref<1x16x8xf32, #tpu.memory_space<vmem>>, %arg2: memref<3x8x8xf32, #tpu.memory_space<vmem>>, %arg3: memref<1x8xf32, #tpu.memory_space<vmem>>, %arg4: memref<3x8x8xf32, #tpu.memory_space<vmem>>, %arg5: memref<1x8xf32, #tpu.memory_space<vmem>>, %arg6: memref<8x8xf32, #tpu.memory_space<vmem>>, %arg7: memref<1x8xf32, #tpu.memory_space<vmem>>, %arg8: memref<3x8x8xf32, #tpu.memory_space<vmem>>, %arg9: memref<1x8xf32, #tpu.memory_space<vmem>>, %arg10: memref<3x8x8xf32, #tpu.memory_space<vmem>>, %arg11: memref<1x8xf32, #tpu.memory_space<vmem>>, %arg12: memref<4x8x32xf32, #tpu.memory_space<vmem>>, %arg13: memref<1x32xf32, #tpu.memory_space<vmem>>, %arg14: memref<1x1x32xf32, #tpu.memory_space<vmem>>, %arg15: memref<20x8xf32, #tpu.memory_space<vmem>>) attributes {dimension_semantics = [#tpu.dimension_semantics<parallel>], iteration_bounds = array<i64: 2>, scalar_prefetch = 0 : i64, scratch_operands = 1 : i64, tpu.core_type = #tpu.core_type<tc>, window_params = [{transform_indices = @transform_0, window_bounds = array<i64: 1, 16, 8>}, {pipeline_mode = #tpu.pipeline_mode<synchronous>, transform_indices = @transform_1, window_bounds = array<i64: 3, 8, 8>}, {pipeline_mode = #tpu.pipeline_mode<synchronous>, transform_indices = @transform_2, window_bounds = array<i64: 1, 8>}, {pipeline_mode = #tpu.pipeline_mode<synchronous>, transform_indices = @transform_3, window_bounds = array<i64: 3, 8, 8>}, {pipeline_mode = #tpu.pipeline_mode<synchronous>, transform_indices = @transform_4, window_bounds = array<i64: 1, 8>}, {pipeline_mode = #tpu.pipeline_mode<synchronous>, transform_indices = @transform_5, window_bounds = array<i64: 8, 8>}, {pipeline_mode = #tpu.pipeline_mode<synchronous>, transform_indices = @transform_6, window_bounds = array<i64: 1, 8>}, {pipeline_mode = #tpu.pipeline_mode<synchronous>, transform_indices = @transform_7, window_bounds = array<i64: 3, 8, 8>}, {pipeline_mode = #tpu.pipeline_mode<synchronous>, transform_indices = @transform_8, window_bounds = array<i64: 1, 8>}, {pipeline_mode = #tpu.pipeline_mode<synchronous>, transform_indices = @transform_9, window_bounds = array<i64: 3, 8, 8>}, {pipeline_mode = #tpu.pipeline_mode<synchronous>, transform_indices = @transform_10, window_bounds = array<i64: 1, 8>}, {pipeline_mode = #tpu.pipeline_mode<synchronous>, transform_indices = @transform_11, window_bounds = array<i64: 4, 8, 32>}, {pipeline_mode = #tpu.pipeline_mode<synchronous>, transform_indices = @transform_12, window_bounds = array<i64: 1, 32>}, {transform_indices = @transform_13, window_bounds = array<i64: 1, 1, 32>}]} {
    %cst = arith.constant 0.000000e+00 : f32
    %0 = vector.broadcast %cst : f32 to vector<4x8xf32>
    %c0 = arith.constant 0 : index
    %c0_0 = arith.constant 0 : index
    %1 = vector.load %arg15[%c0, %c0_0] : memref<20x8xf32, #tpu.memory_space<vmem>>, vector<4x8xf32>
    tpu.vector_store %arg15[%c0, %c0_0], %0 {strides = array<i32>} : memref<20x8xf32, #tpu.memory_space<vmem>>, vector<4x8xf32>,
    %c0_1 = arith.constant 0 : index
    %c0_2 = arith.constant 0 : index
    %c0_3 = arith.constant 0 : index
    %2 = vector.load %arg1[%c0_1, %c0_2, %c0_3] : memref<1x16x8xf32, #tpu.memory_space<vmem>>, vector<1x16x8xf32>
    %3 = vector.shape_cast %2 : vector<1x16x8xf32> to vector<16x8xf32>
    %c4 = arith.constant 4 : index
    %c0_4 = arith.constant 0 : index
    %4 = vector.load %arg15[%c4, %c0_4] : memref<20x8xf32, #tpu.memory_space<vmem>>, vector<16x8xf32>
    tpu.vector_store %arg15[%c4, %c0_4], %3 {strides = array<i32>} : memref<20x8xf32, #tpu.memory_space<vmem>>, vector<16x8xf32>,
    %c2 = arith.constant 2 : index
    %c0_5 = arith.constant 0 : index
    %5 = vector.load %arg15[%c2, %c0_5] : memref<20x8xf32, #tpu.memory_space<vmem>>, vector<16x8xf32>
    %c0_6 = arith.constant 0 : index
    %c0_7 = arith.constant 0 : index
    %c0_8 = arith.constant 0 : index
    %6 = vector.load %arg2[%c0_6, %c0_7, %c0_8] : memref<3x8x8xf32, #tpu.memory_space<vmem>>, vector<1x8x8xf32>
    %7 = vector.shape_cast %6 : vector<1x8x8xf32> to vector<8x8xf32>
    %cst_9 = arith.constant dense<0.000000e+00> : vector<16x8xf32>
    %8 = tpu.matmul %5, %7, %cst_9 {dimension_numbers = #tpu.dot_dimension_numbers<[1], [0], [0], [1], [0, 0, 1, 1], [], []>} : vector<16x8xf32>, vector<8x8xf32>, vector<16x8xf32> -> vector<16x8xf32>
    %c3 = arith.constant 3 : index
    %c0_10 = arith.constant 0 : index
    %9 = vector.load %arg15[%c3, %c0_10] : memref<20x8xf32, #tpu.memory_space<vmem>>, vector<16x8xf32>
    %c1 = arith.constant 1 : index
    %c0_11 = arith.constant 0 : index
    %c0_12 = arith.constant 0 : index
    %10 = vector.load %arg2[%c1, %c0_11, %c0_12] : memref<3x8x8xf32, #tpu.memory_space<vmem>>, vector<1x8x8xf32>
    %11 = vector.shape_cast %10 : vector<1x8x8xf32> to vector<8x8xf32>
    %cst_13 = arith.constant dense<0.000000e+00> : vector<16x8xf32>
    %12 = tpu.matmul %9, %11, %cst_13 {dimension_numbers = #tpu.dot_dimension_numbers<[1], [0], [0], [1], [0, 0, 1, 1], [], []>} : vector<16x8xf32>, vector<8x8xf32>, vector<16x8xf32> -> vector<16x8xf32>
    %13 = arith.addf %8, %12 : vector<16x8xf32>
    %c4_14 = arith.constant 4 : index
    %c0_15 = arith.constant 0 : index
    %14 = vector.load %arg15[%c4_14, %c0_15] : memref<20x8xf32, #tpu.memory_space<vmem>>, vector<16x8xf32>
    %c2_16 = arith.constant 2 : index
    %c0_17 = arith.constant 0 : index
    %c0_18 = arith.constant 0 : index
    %15 = vector.load %arg2[%c2_16, %c0_17, %c0_18] : memref<3x8x8xf32, #tpu.memory_space<vmem>>, vector<1x8x8xf32>
    %16 = vector.shape_cast %15 : vector<1x8x8xf32> to vector<8x8xf32>
    %cst_19 = arith.constant dense<0.000000e+00> : vector<16x8xf32>
    %17 = tpu.matmul %14, %16, %cst_19 {dimension_numbers = #tpu.dot_dimension_numbers<[1], [0], [0], [1], [0, 0, 1, 1], [], []>} : vector<16x8xf32>, vector<8x8xf32>, vector<16x8xf32> -> vector<16x8xf32>
    %18 = arith.addf %13, %17 : vector<16x8xf32>
    %c0_20 = arith.constant 0 : index
    %c0_21 = arith.constant 0 : index
    %19 = vector.load %arg3[%c0_20, %c0_21] : memref<1x8xf32, #tpu.memory_space<vmem>>, vector<1x8xf32>
    %20 = vector.broadcast %19 : vector<1x8xf32> to vector<16x8xf32>
    %21 = arith.addf %18, %20 : vector<16x8xf32>
    %cst_22 = arith.constant 0.000000e+00 : f32
    %22 = vector.broadcast %cst_22 : f32 to vector<16x8xf32>
    %23 = arith.maximumf %21, %22 : vector<16x8xf32>
    %c4_23 = arith.constant 4 : index
    %c0_24 = arith.constant 0 : index
    %24 = vector.load %arg15[%c4_23, %c0_24] : memref<20x8xf32, #tpu.memory_space<vmem>>, vector<16x8xf32>
    tpu.vector_store %arg15[%c4_23, %c0_24], %23 {strides = array<i32>} : memref<20x8xf32, #tpu.memory_space<vmem>>, vector<16x8xf32>,
    %c2_25 = arith.constant 2 : index
    %c0_26 = arith.constant 0 : index
    %25 = vector.load %arg15[%c2_25, %c0_26] : memref<20x8xf32, #tpu.memory_space<vmem>>, vector<16x8xf32>
    %c0_27 = arith.constant 0 : index
    %c0_28 = arith.constant 0 : index
    %c0_29 = arith.constant 0 : index
    %26 = vector.load %arg4[%c0_27, %c0_28, %c0_29] : memref<3x8x8xf32, #tpu.memory_space<vmem>>, vector<1x8x8xf32>
    %27 = vector.shape_cast %26 : vector<1x8x8xf32> to vector<8x8xf32>
    %cst_30 = arith.constant dense<0.000000e+00> : vector<16x8xf32>
    %28 = tpu.matmul %25, %27, %cst_30 {dimension_numbers = #tpu.dot_dimension_numbers<[1], [0], [0], [1], [0, 0, 1, 1], [], []>} : vector<16x8xf32>, vector<8x8xf32>, vector<16x8xf32> -> vector<16x8xf32>
    %c3_31 = arith.constant 3 : index
    %c0_32 = arith.constant 0 : index
    %29 = vector.load %arg15[%c3_31, %c0_32] : memref<20x8xf32, #tpu.memory_space<vmem>>, vector<16x8xf32>
    %c1_33 = arith.constant 1 : index
    %c0_34 = arith.constant 0 : index
    %c0_35 = arith.constant 0 : index
    %30 = vector.load %arg4[%c1_33, %c0_34, %c0_35] : memref<3x8x8xf32, #tpu.memory_space<vmem>>, vector<1x8x8xf32>
    %31 = vector.shape_cast %30 : vector<1x8x8xf32> to vector<8x8xf32>
    %cst_36 = arith.constant dense<0.000000e+00> : vector<16x8xf32>
    %32 = tpu.matmul %29, %31, %cst_36 {dimension_numbers = #tpu.dot_dimension_numbers<[1], [0], [0], [1], [0, 0, 1, 1], [], []>} : vector<16x8xf32>, vector<8x8xf32>, vector<16x8xf32> -> vector<16x8xf32>
    %33 = arith.addf %28, %32 : vector<16x8xf32>
    %c4_37 = arith.constant 4 : index
    %c0_38 = arith.constant 0 : index
    %34 = vector.load %arg15[%c4_37, %c0_38] : memref<20x8xf32, #tpu.memory_space<vmem>>, vector<16x8xf32>
    %c2_39 = arith.constant 2 : index
    %c0_40 = arith.constant 0 : index
    %c0_41 = arith.constant 0 : index
    %35 = vector.load %arg4[%c2_39, %c0_40, %c0_41] : memref<3x8x8xf32, #tpu.memory_space<vmem>>, vector<1x8x8xf32>
    %36 = vector.shape_cast %35 : vector<1x8x8xf32> to vector<8x8xf32>
    %cst_42 = arith.constant dense<0.000000e+00> : vector<16x8xf32>
    %37 = tpu.matmul %34, %36, %cst_42 {dimension_numbers = #tpu.dot_dimension_numbers<[1], [0], [0], [1], [0, 0, 1, 1], [], []>} : vector<16x8xf32>, vector<8x8xf32>, vector<16x8xf32> -> vector<16x8xf32>
    %38 = arith.addf %33, %37 : vector<16x8xf32>
    %c0_43 = arith.constant 0 : index
    %c0_44 = arith.constant 0 : index
    %39 = vector.load %arg5[%c0_43, %c0_44] : memref<1x8xf32, #tpu.memory_space<vmem>>, vector<1x8xf32>
    %40 = vector.broadcast %39 : vector<1x8xf32> to vector<16x8xf32>
    %41 = arith.addf %38, %40 : vector<16x8xf32>
    %c0_45 = arith.constant 0 : index
    %c0_46 = arith.constant 0 : index
    %42 = vector.load %arg6[%c0_45, %c0_46] : memref<8x8xf32, #tpu.memory_space<vmem>>, vector<8x8xf32>
    %cst_47 = arith.constant dense<0.000000e+00> : vector<16x8xf32>
    %43 = tpu.matmul %3, %42, %cst_47 {dimension_numbers = #tpu.dot_dimension_numbers<[1], [0], [0], [1], [0, 0, 1, 1], [], []>} : vector<16x8xf32>, vector<8x8xf32>, vector<16x8xf32> -> vector<16x8xf32>
    %c0_48 = arith.constant 0 : index
    %c0_49 = arith.constant 0 : index
    %44 = vector.load %arg7[%c0_48, %c0_49] : memref<1x8xf32, #tpu.memory_space<vmem>>, vector<1x8xf32>
    %45 = vector.broadcast %44 : vector<1x8xf32> to vector<16x8xf32>
    %46 = arith.addf %43, %45 : vector<16x8xf32>
    %47 = arith.addf %41, %46 : vector<16x8xf32>
    %cst_50 = arith.constant 0.000000e+00 : f32
    %48 = vector.broadcast %cst_50 : f32 to vector<16x8xf32>
    %49 = arith.maximumf %47, %48 : vector<16x8xf32>
    %c4_51 = arith.constant 4 : index
    %c0_52 = arith.constant 0 : index
    %50 = vector.load %arg15[%c4_51, %c0_52] : memref<20x8xf32, #tpu.memory_space<vmem>>, vector<16x8xf32>
    tpu.vector_store %arg15[%c4_51, %c0_52], %49 {strides = array<i32>} : memref<20x8xf32, #tpu.memory_space<vmem>>, vector<16x8xf32>,
    %c0_53 = arith.constant 0 : index
    %c0_54 = arith.constant 0 : index
    %51 = vector.load %arg15[%c0_53, %c0_54] : memref<20x8xf32, #tpu.memory_space<vmem>>, vector<16x8xf32>
    %c0_55 = arith.constant 0 : index
    %c0_56 = arith.constant 0 : index
    %c0_57 = arith.constant 0 : index
    %52 = vector.load %arg8[%c0_55, %c0_56, %c0_57] : memref<3x8x8xf32, #tpu.memory_space<vmem>>, vector<1x8x8xf32>
    %53 = vector.shape_cast %52 : vector<1x8x8xf32> to vector<8x8xf32>
    %cst_58 = arith.constant dense<0.000000e+00> : vector<16x8xf32>
    %54 = tpu.matmul %51, %53, %cst_58 {dimension_numbers = #tpu.dot_dimension_numbers<[1], [0], [0], [1], [0, 0, 1, 1], [], []>} : vector<16x8xf32>, vector<8x8xf32>, vector<16x8xf32> -> vector<16x8xf32>
    %c2_59 = arith.constant 2 : index
    %c0_60 = arith.constant 0 : index
    %55 = vector.load %arg15[%c2_59, %c0_60] : memref<20x8xf32, #tpu.memory_space<vmem>>, vector<16x8xf32>
    %c1_61 = arith.constant 1 : index
    %c0_62 = arith.constant 0 : index
    %c0_63 = arith.constant 0 : index
    %56 = vector.load %arg8[%c1_61, %c0_62, %c0_63] : memref<3x8x8xf32, #tpu.memory_space<vmem>>, vector<1x8x8xf32>
    %57 = vector.shape_cast %56 : vector<1x8x8xf32> to vector<8x8xf32>
    %cst_64 = arith.constant dense<0.000000e+00> : vector<16x8xf32>
    %58 = tpu.matmul %55, %57, %cst_64 {dimension_numbers = #tpu.dot_dimension_numbers<[1], [0], [0], [1], [0, 0, 1, 1], [], []>} : vector<16x8xf32>, vector<8x8xf32>, vector<16x8xf32> -> vector<16x8xf32>
    %59 = arith.addf %54, %58 : vector<16x8xf32>
    %c4_65 = arith.constant 4 : index
    %c0_66 = arith.constant 0 : index
    %60 = vector.load %arg15[%c4_65, %c0_66] : memref<20x8xf32, #tpu.memory_space<vmem>>, vector<16x8xf32>
    %c2_67 = arith.constant 2 : index
    %c0_68 = arith.constant 0 : index
    %c0_69 = arith.constant 0 : index
    %61 = vector.load %arg8[%c2_67, %c0_68, %c0_69] : memref<3x8x8xf32, #tpu.memory_space<vmem>>, vector<1x8x8xf32>
    %62 = vector.shape_cast %61 : vector<1x8x8xf32> to vector<8x8xf32>
    %cst_70 = arith.constant dense<0.000000e+00> : vector<16x8xf32>
    %63 = tpu.matmul %60, %62, %cst_70 {dimension_numbers = #tpu.dot_dimension_numbers<[1], [0], [0], [1], [0, 0, 1, 1], [], []>} : vector<16x8xf32>, vector<8x8xf32>, vector<16x8xf32> -> vector<16x8xf32>
    %64 = arith.addf %59, %63 : vector<16x8xf32>
    %c0_71 = arith.constant 0 : index
    %c0_72 = arith.constant 0 : index
    %65 = vector.load %arg9[%c0_71, %c0_72] : memref<1x8xf32, #tpu.memory_space<vmem>>, vector<1x8xf32>
    %66 = vector.broadcast %65 : vector<1x8xf32> to vector<16x8xf32>
    %67 = arith.addf %64, %66 : vector<16x8xf32>
    %cst_73 = arith.constant 0.000000e+00 : f32
    %68 = vector.broadcast %cst_73 : f32 to vector<16x8xf32>
    %69 = arith.maximumf %67, %68 : vector<16x8xf32>
    %c4_74 = arith.constant 4 : index
    %c0_75 = arith.constant 0 : index
    %70 = vector.load %arg15[%c4_74, %c0_75] : memref<20x8xf32, #tpu.memory_space<vmem>>, vector<16x8xf32>
    tpu.vector_store %arg15[%c4_74, %c0_75], %69 {strides = array<i32>} : memref<20x8xf32, #tpu.memory_space<vmem>>, vector<16x8xf32>,
    %c0_76 = arith.constant 0 : index
    %c0_77 = arith.constant 0 : index
    %71 = vector.load %arg15[%c0_76, %c0_77] : memref<20x8xf32, #tpu.memory_space<vmem>>, vector<16x8xf32>
    %c0_78 = arith.constant 0 : index
    %c0_79 = arith.constant 0 : index
    %c0_80 = arith.constant 0 : index
    %72 = vector.load %arg10[%c0_78, %c0_79, %c0_80] : memref<3x8x8xf32, #tpu.memory_space<vmem>>, vector<1x8x8xf32>
    %73 = vector.shape_cast %72 : vector<1x8x8xf32> to vector<8x8xf32>
    %cst_81 = arith.constant dense<0.000000e+00> : vector<16x8xf32>
    %74 = tpu.matmul %71, %73, %cst_81 {dimension_numbers = #tpu.dot_dimension_numbers<[1], [0], [0], [1], [0, 0, 1, 1], [], []>} : vector<16x8xf32>, vector<8x8xf32>, vector<16x8xf32> -> vector<16x8xf32>
    %c2_82 = arith.constant 2 : index
    %c0_83 = arith.constant 0 : index
    %75 = vector.load %arg15[%c2_82, %c0_83] : memref<20x8xf32, #tpu.memory_space<vmem>>, vector<16x8xf32>
    %c1_84 = arith.constant 1 : index
    %c0_85 = arith.constant 0 : index
    %c0_86 = arith.constant 0 : index
    %76 = vector.load %arg10[%c1_84, %c0_85, %c0_86] : memref<3x8x8xf32, #tpu.memory_space<vmem>>, vector<1x8x8xf32>
    %77 = vector.shape_cast %76 : vector<1x8x8xf32> to vector<8x8xf32>
    %cst_87 = arith.constant dense<0.000000e+00> : vector<16x8xf32>
    %78 = tpu.matmul %75, %77, %cst_87 {dimension_numbers = #tpu.dot_dimension_numbers<[1], [0], [0], [1], [0, 0, 1, 1], [], []>} : vector<16x8xf32>, vector<8x8xf32>, vector<16x8xf32> -> vector<16x8xf32>
    %79 = arith.addf %74, %78 : vector<16x8xf32>
    %c4_88 = arith.constant 4 : index
    %c0_89 = arith.constant 0 : index
    %80 = vector.load %arg15[%c4_88, %c0_89] : memref<20x8xf32, #tpu.memory_space<vmem>>, vector<16x8xf32>
    %c2_90 = arith.constant 2 : index
    %c0_91 = arith.constant 0 : index
    %c0_92 = arith.constant 0 : index
    %81 = vector.load %arg10[%c2_90, %c0_91, %c0_92] : memref<3x8x8xf32, #tpu.memory_space<vmem>>, vector<1x8x8xf32>
    %82 = vector.shape_cast %81 : vector<1x8x8xf32> to vector<8x8xf32>
    %cst_93 = arith.constant dense<0.000000e+00> : vector<16x8xf32>
    %83 = tpu.matmul %80, %82, %cst_93 {dimension_numbers = #tpu.dot_dimension_numbers<[1], [0], [0], [1], [0, 0, 1, 1], [], []>} : vector<16x8xf32>, vector<8x8xf32>, vector<16x8xf32> -> vector<16x8xf32>
    %84 = arith.addf %79, %83 : vector<16x8xf32>
    %c0_94 = arith.constant 0 : index
    %c0_95 = arith.constant 0 : index
    %85 = vector.load %arg11[%c0_94, %c0_95] : memref<1x8xf32, #tpu.memory_space<vmem>>, vector<1x8xf32>
    %86 = vector.broadcast %85 : vector<1x8xf32> to vector<16x8xf32>
    %87 = arith.addf %84, %86 : vector<16x8xf32>
    %88 = arith.addf %87, %49 : vector<16x8xf32>
    %cst_96 = arith.constant 0.000000e+00 : f32
    %89 = vector.broadcast %cst_96 : f32 to vector<16x8xf32>
    %90 = arith.maximumf %88, %89 : vector<16x8xf32>
    %c4_97 = arith.constant 4 : index
    %c0_98 = arith.constant 0 : index
    %91 = vector.load %arg15[%c4_97, %c0_98] : memref<20x8xf32, #tpu.memory_space<vmem>>, vector<16x8xf32>
    tpu.vector_store %arg15[%c4_97, %c0_98], %90 {strides = array<i32>} : memref<20x8xf32, #tpu.memory_space<vmem>>, vector<16x8xf32>,
    %cst_99 = arith.constant 1.000000e+00 : f32
    %92 = vector.broadcast %cst_99 : f32 to vector<1x4xf32>
    %c0_100 = arith.constant 0 : index
    %c0_101 = arith.constant 0 : index
    %93 = vector.load %arg13[%c0_100, %c0_101] : memref<1x32xf32, #tpu.memory_space<vmem>>, vector<1x32xf32>
    %c4_102 = arith.constant 4 : index
    %c0_103 = arith.constant 0 : index
    %94 = vector.load %arg15[%c4_102, %c0_103] : memref<20x8xf32, #tpu.memory_space<vmem>>, vector<4x8xf32>
    %cst_104 = arith.constant dense<0.000000e+00> : vector<1x8xf32>
    %95 = tpu.matmul %92, %94, %cst_104 {dimension_numbers = #tpu.dot_dimension_numbers<[1], [0], [0], [1], [0, 0, 1, 1], [], []>} : vector<1x4xf32>, vector<4x8xf32>, vector<1x8xf32> -> vector<1x8xf32>
    %c0_105 = arith.constant 0 : index
    %c0_106 = arith.constant 0 : index
    %c0_107 = arith.constant 0 : index
    %96 = vector.load %arg12[%c0_105, %c0_106, %c0_107] : memref<4x8x32xf32, #tpu.memory_space<vmem>>, vector<1x8x32xf32>
    %97 = vector.shape_cast %96 : vector<1x8x32xf32> to vector<8x32xf32>
    %cst_108 = arith.constant dense<0.000000e+00> : vector<1x32xf32>
    %98 = tpu.matmul %95, %97, %cst_108 {dimension_numbers = #tpu.dot_dimension_numbers<[1], [0], [0], [1], [0, 0, 1, 1], [], []>} : vector<1x8xf32>, vector<8x32xf32>, vector<1x32xf32> -> vector<1x32xf32>
    %99 = arith.addf %93, %98 : vector<1x32xf32>
    %c8 = arith.constant 8 : index
    %c0_109 = arith.constant 0 : index
    %100 = vector.load %arg15[%c8, %c0_109] : memref<20x8xf32, #tpu.memory_space<vmem>>, vector<4x8xf32>
    %cst_110 = arith.constant dense<0.000000e+00> : vector<1x8xf32>
    %101 = tpu.matmul %92, %100, %cst_110 {dimension_numbers = #tpu.dot_dimension_numbers<[1], [0], [0], [1], [0, 0, 1, 1], [], []>} : vector<1x4xf32>, vector<4x8xf32>, vector<1x8xf32> -> vector<1x8xf32>
    %c1_111 = arith.constant 1 : index
    %c0_112 = arith.constant 0 : index
    %c0_113 = arith.constant 0 : index
    %102 = vector.load %arg12[%c1_111, %c0_112, %c0_113] : memref<4x8x32xf32, #tpu.memory_space<vmem>>, vector<1x8x32xf32>
    %103 = vector.shape_cast %102 : vector<1x8x32xf32> to vector<8x32xf32>
    %cst_114 = arith.constant dense<0.000000e+00> : vector<1x32xf32>
    %104 = tpu.matmul %101, %103, %cst_114 {dimension_numbers = #tpu.dot_dimension_numbers<[1], [0], [0], [1], [0, 0, 1, 1], [], []>} : vector<1x8xf32>, vector<8x32xf32>, vector<1x32xf32> -> vector<1x32xf32>
    %105 = arith.addf %99, %104 : vector<1x32xf32>
    %c12 = arith.constant 12 : index
    %c0_115 = arith.constant 0 : index
    %106 = vector.load %arg15[%c12, %c0_115] : memref<20x8xf32, #tpu.memory_space<vmem>>, vector<4x8xf32>
    %cst_116 = arith.constant dense<0.000000e+00> : vector<1x8xf32>
    %107 = tpu.matmul %92, %106, %cst_116 {dimension_numbers = #tpu.dot_dimension_numbers<[1], [0], [0], [1], [0, 0, 1, 1], [], []>} : vector<1x4xf32>, vector<4x8xf32>, vector<1x8xf32> -> vector<1x8xf32>
    %c2_117 = arith.constant 2 : index
    %c0_118 = arith.constant 0 : index
    %c0_119 = arith.constant 0 : index
    %108 = vector.load %arg12[%c2_117, %c0_118, %c0_119] : memref<4x8x32xf32, #tpu.memory_space<vmem>>, vector<1x8x32xf32>
    %109 = vector.shape_cast %108 : vector<1x8x32xf32> to vector<8x32xf32>
    %cst_120 = arith.constant dense<0.000000e+00> : vector<1x32xf32>
    %110 = tpu.matmul %107, %109, %cst_120 {dimension_numbers = #tpu.dot_dimension_numbers<[1], [0], [0], [1], [0, 0, 1, 1], [], []>} : vector<1x8xf32>, vector<8x32xf32>, vector<1x32xf32> -> vector<1x32xf32>
    %111 = arith.addf %105, %110 : vector<1x32xf32>
    %c16 = arith.constant 16 : index
    %c0_121 = arith.constant 0 : index
    %112 = vector.load %arg15[%c16, %c0_121] : memref<20x8xf32, #tpu.memory_space<vmem>>, vector<4x8xf32>
    %cst_122 = arith.constant dense<0.000000e+00> : vector<1x8xf32>
    %113 = tpu.matmul %92, %112, %cst_122 {dimension_numbers = #tpu.dot_dimension_numbers<[1], [0], [0], [1], [0, 0, 1, 1], [], []>} : vector<1x4xf32>, vector<4x8xf32>, vector<1x8xf32> -> vector<1x8xf32>
    %c3_123 = arith.constant 3 : index
    %c0_124 = arith.constant 0 : index
    %c0_125 = arith.constant 0 : index
    %114 = vector.load %arg12[%c3_123, %c0_124, %c0_125] : memref<4x8x32xf32, #tpu.memory_space<vmem>>, vector<1x8x32xf32>
    %115 = vector.shape_cast %114 : vector<1x8x32xf32> to vector<8x32xf32>
    %cst_126 = arith.constant dense<0.000000e+00> : vector<1x32xf32>
    %116 = tpu.matmul %113, %115, %cst_126 {dimension_numbers = #tpu.dot_dimension_numbers<[1], [0], [0], [1], [0, 0, 1, 1], [], []>} : vector<1x8xf32>, vector<8x32xf32>, vector<1x32xf32> -> vector<1x32xf32>
    %117 = arith.addf %111, %116 : vector<1x32xf32>
    %c0_127 = arith.constant 0 : index
    %c0_128 = arith.constant 0 : index
    %c0_129 = arith.constant 0 : index
    %118 = vector.load %arg14[%c0_127, %c0_128, %c0_129] : memref<1x1x32xf32, #tpu.memory_space<vmem>>, vector<1x1x32xf32>
    %119 = vector.shape_cast %118 : vector<1x1x32xf32> to vector<1x32xf32>
    %120 = vector.shape_cast %117 : vector<1x32xf32> to vector<1x1x32xf32>
    tpu.vector_store %arg14[%c0_127, %c0_128, %c0_129], %120 {strides = array<i32>} : memref<1x1x32xf32, #tpu.memory_space<vmem>>, vector<1x1x32xf32>,
    return
  }
  func.func @transform_0(%arg0: i32) -> (i32, i32, i32) {
    %c0_i32 = arith.constant 0 : i32
    %c0_i32_0 = arith.constant 0 : i32
    %c0_i32_1 = arith.constant 0 : i32
    return %arg0, %c0_i32, %c0_i32_0 : i32, i32, i32
  }
  func.func @transform_1(%arg0: i32) -> (i32, i32, i32) {
    %c0_i32 = arith.constant 0 : i32
    %c0_i32_0 = arith.constant 0 : i32
    %c0_i32_1 = arith.constant 0 : i32
    %c0_i32_2 = arith.constant 0 : i32
    return %c0_i32, %c0_i32_0, %c0_i32_1 : i32, i32, i32
  }
  func.func @transform_2(%arg0: i32) -> (i32, i32) {
    %c0_i32 = arith.constant 0 : i32
    %c0_i32_0 = arith.constant 0 : i32
    %c0_i32_1 = arith.constant 0 : i32
    return %c0_i32, %c0_i32_0 : i32, i32
  }
  func.func @transform_3(%arg0: i32) -> (i32, i32, i32) {
    %c0_i32 = arith.constant 0 : i32
    %c0_i32_0 = arith.constant 0 : i32
    %c0_i32_1 = arith.constant 0 : i32
    %c0_i32_2 = arith.constant 0 : i32
    return %c0_i32, %c0_i32_0, %c0_i32_1 : i32, i32, i32
  }
  func.func @transform_4(%arg0: i32) -> (i32, i32) {
    %c0_i32 = arith.constant 0 : i32
    %c0_i32_0 = arith.constant 0 : i32
    %c0_i32_1 = arith.constant 0 : i32
    return %c0_i32, %c0_i32_0 : i32, i32
  }
  func.func @transform_5(%arg0: i32) -> (i32, i32) {
    %c0_i32 = arith.constant 0 : i32
    %c0_i32_0 = arith.constant 0 : i32
    %c0_i32_1 = arith.constant 0 : i32
    return %c0_i32, %c0_i32_0 : i32, i32
  }
  func.func @transform_6(%arg0: i32) -> (i32, i32) {
    %c0_i32 = arith.constant 0 : i32
    %c0_i32_0 = arith.constant 0 : i32
    %c0_i32_1 = arith.constant 0 : i32
    return %c0_i32, %c0_i32_0 : i32, i32
  }
  func.func @transform_7(%arg0: i32) -> (i32, i32, i32) {
    %c0_i32 = arith.constant 0 : i32
    %c0_i32_0 = arith.constant 0 : i32
    %c0_i32_1 = arith.constant 0 : i32
    %c0_i32_2 = arith.constant 0 : i32
    return %c0_i32, %c0_i32_0, %c0_i32_1 : i32, i32, i32
  }
  func.func @transform_8(%arg0: i32) -> (i32, i32) {
    %c0_i32 = arith.constant 0 : i32
    %c0_i32_0 = arith.constant 0 : i32
    %c0_i32_1 = arith.constant 0 : i32
    return %c0_i32, %c0_i32_0 : i32, i32
  }
  func.func @transform_9(%arg0: i32) -> (i32, i32, i32) {
    %c0_i32 = arith.constant 0 : i32
    %c0_i32_0 = arith.constant 0 : i32
    %c0_i32_1 = arith.constant 0 : i32
    %c0_i32_2 = arith.constant 0 : i32
    return %c0_i32, %c0_i32_0, %c0_i32_1 : i32, i32, i32
  }
  func.func @transform_10(%arg0: i32) -> (i32, i32) {
    %c0_i32 = arith.constant 0 : i32
    %c0_i32_0 = arith.constant 0 : i32
    %c0_i32_1 = arith.constant 0 : i32
    return %c0_i32, %c0_i32_0 : i32, i32
  }
  func.func @transform_11(%arg0: i32) -> (i32, i32, i32) {
    %c0_i32 = arith.constant 0 : i32
    %c0_i32_0 = arith.constant 0 : i32
    %c0_i32_1 = arith.constant 0 : i32
    %c0_i32_2 = arith.constant 0 : i32
    return %c0_i32, %c0_i32_0, %c0_i32_1 : i32, i32, i32
  }
  func.func @transform_12(%arg0: i32) -> (i32, i32) {
    %c0_i32 = arith.constant 0 : i32
    %c0_i32_0 = arith.constant 0 : i32
    %c0_i32_1 = arith.constant 0 : i32
    return %c0_i32, %c0_i32_0 : i32, i32
  }
  func.func @transform_13(%arg0: i32) -> (i32, i32, i32) {
    %c0_i32 = arith.constant 0 : i32
    %c0_i32_0 = arith.constant 0 : i32
    %c0_i32_1 = arith.constant 0 : i32
    return %arg0, %c0_i32, %c0_i32_0 : i32, i32, i32
  }
}

</mosaic_0001>

<bundles_post_ra>
// kernel: tcn_encoder_forward.1
= control target key start
LH: loop header
LB: loop body
LE: loop exit
PB: predicated region body
PF: predicated region fallthrough
CT: control target
= control target key end

     0   :  { %s2612_s25 = smov 0   ;;  %s2781_s0 = inlined_call_operand.vmem [shape: f32[2,16,8], index: 0, kind: input, shape index: {}]   ;;  %s2782_s1 = inlined_call_operand.vmem [shape: f32[3,8,8], index: 1, kind: input, shape index: {}]   ;;  %s2783_s2 = inlined_call_operand.vmem [shape: f32[1,8], index: 2, kind: input, shape index: {}]   ;;  %s2784_s3 = inlined_call_operand.vmem [shape: f32[3,8,8], index: 3, kind: input, shape index: {}]   ;;  %s2785_s4 = inlined_call_operand.vmem [shape: f32[1,8], index: 4, kind: input, shape index: {}]   ;;  %s2786_s5 = inlined_call_operand.vmem [shape: f32[8,8], index: 5, kind: input, shape index: {}]   ;;  %s2787_s6 = inlined_call_operand.vmem [shape: f32[1,8], index: 6, kind: input, shape index: {}]   ;;  %s2788_s7 = inlined_call_operand.vmem [shape: f32[3,8,8], index: 7, kind: input, shape index: {}]   ;;  %s2789_s8 = inlined_call_operand.vmem [shape: f32[1,8], index: 8, kind: input, shape index: {}]   ;;  %s2790_s9 = inlined_call_operand.vmem [shape: f32[3,8,8], index: 9, kind: input, shape index: {}]   ;;  %s2791_s10 = inlined_call_operand.vmem [shape: f32[1,8], index: 10, kind: input, shape index: {}]   ;;  %s2792_s11 = inlined_call_operand.vmem [shape: f32[4,8,32], index: 11, kind: input, shape index: {}]   ;;  %s2793_s12 = inlined_call_operand.vmem [shape: f32[1,32], index: 12, kind: input, shape index: {}]   ;;  %s2794_s13 = inlined_call_operand.vmem [shape: f32[2,1,32], index: 13, kind: output, shape index: {}]  }
   0x1 LB: > { %s2267_s26 = sadd.s32 4294967295, %s2537_s25   ;;  %p2271_p0 = scmp.ge.s32.totalorder %s2537_s25, 1  ;;  %s2537_s25 = sphi %s2612_s25, %s23_s25  }
   0x2   : > { %p387_p1 = scmp.lt.s32.totalorder %s2537_s25, 3 }
   0x4   : > { %p388_p2 = pnand %p2271_p0, %p387_p1 }
   0x5   : > { %v2274_v0 = vld [vmem:[%s2782_s1 + $0x8] sm:$0xff] (!%p388_p2)  ;;  %p429_p3 = scmp.lt.s32.totalorder (!%p388_p2), %s2267_s26, 1  ;;  %vm437_vm0 = vcmask (!%p388_p2), 60416   ;;  %v446_v1 = vld [vmem:[%s2782_s1] sm:$0xff] (!%p388_p2)  ;;  %v2539_v2 = vmov (!%p388_p2), 0.0   ;;  %vm441_vm1 = vcmask (!%p388_p2), 64512  }
   0x6   : > { %391 = sbr.rel (%p388_p2) target bundleno = 1457 (0x5b1), region = 72  ;;  %2386 = vmatprep.subr.mxu0 (!%p388_p2), %v2274_v0  ;;  %438 = vst.msk [vmem:[#allocation2] sm:$0xf] (!%p388_p2), %vm437_vm0, %v2539_v2  ;;  %v2279_v8 = vld [vmem:[%s2782_s1 + $0x10] sm:$0xff] (!%p388_p2)  ;;  %v2283_v12 = vld [vmem:[%s2784_s3 + $0x8] sm:$0xff] (!%p388_p2)  ;;  %v715_v13 = vld [vmem:[%s2784_s3] sm:$0xff] (!%p388_p2) }
   0x7   : > { %2387 = vmatpush3.msra.mxu0 (!%p388_p2), %v2274_v0  ;;  %2401 = vmatprep.subr.mxu1 (!%p388_p2), %v2283_v12  ;;  %v2282_v14 = vld [vmem:[%s2783_s2] ss:$0 sm:$0xff] (!%p388_p2)  ;;  %v2288_v23 = vld [vmem:[%s2784_s3 + $0x10] sm:$0xff] (!%p388_p2)  ;;  %v2295_v29 = vld [vmem:[%s2788_s7 + $0x8] sm:$0xff] (!%p388_p2)  ;;  %vm2540_vm2 = vmmov (!%p388_p2), 0   ;;  %vm1619_vm3 = vcmask (!%p388_p2), 1043456  }
   0x8   : > { %2391 = vmatprep.subr.mxu0 (!%p388_p2), %v446_v1  ;;  %2402 = vmatpush3.msra.mxu1 (!%p388_p2), %v2283_v12  ;;  %v978_v26 = vld [vmem:[%s2786_s5] sm:$0xff] (!%p388_p2)  ;;  %v2300_v43 = vld [vmem:[%s2788_s7 + $0x10] sm:$0xff] (!%p388_p2)  ;;  %v2304_v48 = vld [vmem:[%s2790_s9 + $0x8] sm:$0xff] (!%p388_p2)  ;;  %vm1615_vm4 = vcmask (!%p388_p2), 31744   ;;  %v2541_v12 = vmov (!%p388_p2), 1.0   ;;  %vm2218_vm5 = vcmask (!%p388_p2), 253952  }
   0x9   : > { %2406 = vmatprep.subr.mxu1 (!%p388_p2), %v715_v13  ;;  %v1075_v30 = vld [vmem:[%s2788_s7] sm:$0xff] (!%p388_p2)  ;;  %v2309_v59 = vld [vmem:[%s2790_s9 + $0x10] sm:$0xff] (!%p388_p2) }
   0xa   : > { %v2291_v31 = vld [vmem:[%s2785_s4] ss:$0 sm:$0xff] (!%p388_p2) }
   0xb   : > { %v2292_v33 = vld [vmem:[%s2787_s6] ss:$0 sm:$0xff] (!%p388_p2) }
   0xc   : > { %v1344_v49 = vld [vmem:[%s2790_s9] sm:$0xff] (!%p388_p2) }
   0xd   : > { %s2796_s26 = smov (!%p429_p3, %s2267_s26), 1  ;;  %v2303_v50 = vld [vmem:[%s2789_s8] ss:$0 sm:$0xff] }
   0xe   : > { %s2330_s14 = sshll.u32 %s2796_s26, 4  ;;  %v2312_v0 = vld [vmem:[%s2791_s10] ss:$0 sm:$0xff] }
   0xf   : > { %s433_s17 = scalar_lea.vmem %s2781_s0, %s2330_s14 }
  0x10   : > { %v439_v3 = vld [vmem:[%s433_s17] sm:$0xff]  ;;  %v440_v4 = vld [vmem:[%s433_s17 + $0x8] sm:$0xff]  ;;  %s436_s17 = scalar_lea.vmem %s2794_s13, %s2796_s26 }
  0x11   : > { %442 = vst.msk [vmem:[#allocation2 + $0x4] sm:$0xff] %vm441_vm1, %v439_v3  ;;  %443 = vst.msk [vmem:[#allocation2 + $0xc] sm:$0xff] %vm441_vm1, %v440_v4 }
  0x18   : > { %v447_v5 = vld [vmem:[#allocation2 + $0x3] sm:$0xff]  ;;  %v448_v6 = vld [vmem:[#allocation2 + $0xb] sm:$0xff] }
  0x19   : > { %v444_v7 = vld [vmem:[#allocation2 + $0x2] sm:$0xff]  ;;  %2388 = vmatprep.mubr.msk.f32.mxu0 %vm441_vm1, %v447_v5  ;;  %v445_v9 = vld [vmem:[#allocation2 + $0xa] sm:$0xff] }
  0x1a   : > { %2389 = vmatmul.mubr.msk.f32.vlgmr.msra.gmra.mrb[0].mxu0 %vm441_vm1, %v448_v6  ;;  %v613_v10 = vld [vmem:[#allocation2 + $0x4] sm:$0xff]  ;;  %v614_v11 = vld [vmem:[#allocation2 + $0xc] sm:$0xff] }
  0x1b   : > { %2392 = vmatpush3.msra.mxu0 %v446_v1  ;;  %2393 = vmatprep.mubr.msk.f32.mxu0 %vm441_vm1, %v444_v7 }
  0x1c   : > { %2396 = vmatprep.subr.mxu0 %v2279_v8 }
  0x22   : > { %2394 = vmatmul.mubr.msk.f32.vlgmr.msra.gmra.mrb[0].mxu0 %vm441_vm1, %v445_v9 }
  0x23   : > { %2397 = vmatpush3.msra.mxu0 %v2279_v8  ;;  %2398 = vmatprep.mubr.msk.f32.mxu0 %vm441_vm1, %v613_v10 }
  0x24   : > { %2421 = vmatprep.subr.mxu0 %v2295_v29 }
  0x2a   : > { %2399 = vmatmul.mubr.msk.f32.vlgmr.msra.gmra.mrb[0].mxu0 %vm441_vm1, %v614_v11 }
  0x2b   : > { %2422 = vmatpush3.msra.mxu0 %v2295_v29 }
  0x2c   : > { %2426 = vmatprep.subr.mxu0 %v1075_v30 }
  0xfd   : > { %v2400_v15 = vpop.f32.mrb[0].mxu0 }
  0xfe   : > { %v708_v16 = vadd.f32 %v2400_v15, %v2282_v14  ;;  %v689_v17 = vpop.f32.mrb[1].mxu0  ;;  %v1693_v15 = vld [vmem:[%s2792_s11] sm:$0xff] }
  0xff   : > { %v707_v18 = vadd.f32 %v2282_v14, %v689_v17 }
 0x100   : > { %v710_v19 = vmax.f32 %v708_v16, 0.0  ;;  %v2318_v16 = vld [vmem:[%s2792_s11 + $0x8] sm:$0xff] }
 0x101   : > { %v709_v20 = vmax.f32 %v707_v18, 0.0 }
 0x102   : > { %712 = vst.msk [vmem:[#allocation2 + $0xc] sm:$0xff] %vm441_vm1, %v710_v19 }
 0x103   : > { %711 = vst.msk [vmem:[#allocation2 + $0x4] sm:$0xff] %vm441_vm1, %v709_v20 }
 0x109   : > { %v883_v28 = vld [vmem:[#allocation2 + $0xc] sm:$0xff] }
 0x10a   : > { %v716_v21 = vld [vmem:[#allocation2 + $0x3] sm:$0xff]  ;;  %v717_v22 = vld [vmem:[#allocation2 + $0xb] sm:$0xff] }
 0x10b   : > { %2403 = vmatprep.mubr.msk.f32.mxu1 %vm441_vm1, %v716_v21  ;;  %v713_v24 = vld [vmem:[#allocation2 + $0x2] sm:$0xff]  ;;  %v714_v25 = vld [vmem:[#allocation2 + $0xa] sm:$0xff] }
 0x10c   : > { %2404 = vmatmul.mubr.msk.f32.vlgmr.msra.gmra.mrb[0].mxu1 %vm441_vm1, %v717_v22  ;;  %v882_v27 = vld [vmem:[#allocation2 + $0x4] sm:$0xff] }
 0x10d   : > { %2408 = vmatprep.mubr.msk.f32.mxu1 %vm441_vm1, %v713_v24  ;;  %2407 = vmatpush3.msra.mxu1 %v715_v13 }
 0x10e   : > { %2411 = vmatprep.subr.mxu1 %v2288_v23 }
 0x114   : > { %2409 = vmatmul.mubr.msk.f32.vlgmr.msra.gmra.mrb[0].mxu1 %vm441_vm1, %v714_v25 }
 0x115   : > { %2413 = vmatprep.mubr.msk.f32.mxu1 %vm441_vm1, %v882_v27  ;;  %2412 = vmatpush3.msra.mxu1 %v2288_v23  ;;  %v2322_v23 = vld [vmem:[%s2792_s11 + $0x10] sm:$0xff]  ;;  %v1613_v27 = vld [vmem:[%s2793_s12] sm:$0x1] }
 0x116   : > { %2416 = vmatprep.subr.mxu1 %v978_v26 }
 0x11c   : > { %2414 = vmatmul.mubr.msk.f32.vlgmr.msra.gmra.mrb[0].mxu1 %vm441_vm1, %v883_v28 }
 0x11d   : > { %2417 = vmatpush3.msra.mxu1 %v978_v26  ;;  %2418 = vmatprep.mubr.msk.f32.mxu1 %vm441_vm1, %v439_v3  ;;  %v2326_v26 = vld [vmem:[%s2792_s11 + $0x18] sm:$0xff] }
 0x11e   : > { %2436 = vmatprep.subr.mxu1 %v2304_v48 }
 0x124   : > { %2419 = vmatmul.mubr.msk.f32.vlgmr.msra.gmra.mrb[0].mxu1 %vm441_vm1, %v440_v4 }
 0x125   : > { %2437 = vmatpush3.msra.mxu1 %v2304_v48 }
 0x126   : > { %2441 = vmatprep.subr.mxu1 %v1344_v49 }
 0x1f7   : > { %v2420_v32 = vpop.f32.mrb[0].mxu1 }
 0x1f8   : > { %v2491_v34 = vadd.f32 %v2420_v32, %v2291_v31  ;;  %v1058_v35 = vpop.f32.mrb[1].mxu1 }
 0x1f9   : > { %v2493_v36 = vadd.f32 %v2291_v31, %v1058_v35 }
 0x1fa   : > { %v2681_v37 = vadd.f32 %v2491_v34, %v2292_v33 }
 0x1fb   : > { %v2683_v38 = vadd.f32 %v2493_v36, %v2292_v33 }
 0x1fc   : > { %v1070_v39 = vmax.f32 %v2681_v37, 0.0 }
 0x1fd   : > { %v1069_v40 = vmax.f32 %v2683_v38, 0.0 }
 0x1fe   : > { %1072 = vst.msk [vmem:[#allocation2 + $0xc] sm:$0xff] %vm441_vm1, %v1070_v39 }
 0x1ff   : > { %1071 = vst.msk [vmem:[#allocation2 + $0x4] sm:$0xff] %vm441_vm1, %v1069_v40 }
 0x205   : > { %v1243_v47 = vld [vmem:[#allocation2 + $0xc] sm:$0xff] }
 0x206   : > { %v1076_v41 = vld [vmem:[#allocation2 + $0x2] sm:$0xff]  ;;  %v1077_v42 = vld [vmem:[#allocation2 + $0xa] sm:$0xff] }
 0x207   : > { %2423 = vmatprep.mubr.msk.f32.mxu0 %vm441_vm1, %v1076_v41  ;;  %v1073_v44 = vld [vmem:[#allocation2] sm:$0xff]  ;;  %v1074_v45 = vld [vmem:[#allocation2 + $0x8] sm:$0xff] }
 0x208   : > { %2424 = vmatmul.mubr.msk.f32.vlgmr.msra.gmra.mrb[2].mxu0 %vm441_vm1, %v1077_v42  ;;  %v1242_v46 = vld [vmem:[#allocation2 + $0x4] sm:$0xff] }
 0x209   : > { %2428 = vmatprep.mubr.msk.f32.mxu0 %vm441_vm1, %v1073_v44  ;;  %2427 = vmatpush3.msra.mxu0 %v1075_v30 }
 0x20a   : > { %2431 = vmatprep.subr.mxu0 %v2300_v43 }
 0x210   : > { %2429 = vmatmul.mubr.msk.f32.vlgmr.msra.gmra.mrb[2].mxu0 %vm441_vm1, %v1074_v45 }
 0x211   : > { %2433 = vmatprep.mubr.msk.f32.mxu0 %vm441_vm1, %v1242_v46  ;;  %2432 = vmatpush3.msra.mxu0 %v2300_v43 }
 0x212   : > { %2451 = vmatprep.subr.mxu0 %v2539_v2 }
 0x218   : > { %2434 = vmatmul.mubr.msk.f32.vlgmr.msra.gmra.mrb[2].mxu0 %vm441_vm1, %v1243_v47 }
 0x219   : > { %2453 = vmatprep.mubr.msk.f32.mxu0 %vm2540_vm2, %v2539_v2 }
 0x2eb   : > { %v2435_v51 = vpop.f32.mrb[2].mxu0 }
 0x2ec   : > { %v1337_v52 = vadd.f32 %v2435_v51, %v2303_v50  ;;  %v1318_v53 = vpop.f32.mrb[3].mxu0 }
 0x2ed   : > { %v1336_v54 = vadd.f32 %v2303_v50, %v1318_v53 }
 0x2ee   : > { %v1339_v55 = vmax.f32 %v1337_v52, 0.0 }
 0x2ef   : > { %v1338_v56 = vmax.f32 %v1336_v54, 0.0 }
 0x2f0   : > { %1341 = vst.msk [vmem:[#allocation2 + $0xc] sm:$0xff] %vm441_vm1, %v1339_v55 }
 0x2f1   : > { %1340 = vst.msk [vmem:[#allocation2 + $0x4] sm:$0xff] %vm441_vm1, %v1338_v56 }
 0x2f7   : > { %v1512_v63 = vld [vmem:[#allocation2 + $0xc] sm:$0xff] }
 0x2f8   : > { %v1345_v57 = vld [vmem:[#allocation2 + $0x2] sm:$0xff]  ;;  %v1346_v58 = vld [vmem:[#allocation2 + $0xa] sm:$0xff] }
 0x2f9   : > { %2438 = vmatprep.mubr.msk.f32.mxu1 %vm441_vm1, %v1345_v57  ;;  %v1342_v60 = vld [vmem:[#allocation2] sm:$0xff]  ;;  %v1343_v61 = vld [vmem:[#allocation2 + $0x8] sm:$0xff] }
 0x2fa   : > { %2439 = vmatmul.mubr.msk.f32.vlgmr.msra.gmra.mrb[2].mxu1 %vm441_vm1, %v1346_v58  ;;  %v1511_v62 = vld [vmem:[#allocation2 + $0x4] sm:$0xff] }
 0x2fb   : > { %2443 = vmatprep.mubr.msk.f32.mxu1 %vm441_vm1, %v1342_v60  ;;  %2442 = vmatpush3.msra.mxu1 %v1344_v49 }
 0x2fc   : > { %2446 = vmatprep.subr.mxu1 %v2309_v59 }
 0x302   : > { %2444 = vmatmul.mubr.msk.f32.vlgmr.msra.gmra.mrb[2].mxu1 %vm441_vm1, %v1343_v61 }
 0x303   : > { %2448 = vmatprep.mubr.msk.f32.mxu1 %vm441_vm1, %v1511_v62  ;;  %2447 = vmatpush3.msra.mxu1 %v2309_v59 }
 0x304   : > { %2461 = vmatprep.subr.mxu1 %v2539_v2 }
 0x30a   : > { %2449 = vmatmul.mubr.msk.f32.vlgmr.msra.gmra.mrb[2].mxu1 %vm441_vm1, %v1512_v63 }
 0x30b   : > { %2463 = vmatprep.mubr.msk.f32.mxu1 %vm2540_vm2, %v2539_v2 }
 0x3dd   : > { %v2450_v1 = vpop.f32.mrb[2].mxu1 }
 0x3de   : > { %v1606_v3 = vadd.f32 %v2450_v1, %v2312_v0  ;;  %v1587_v4 = vpop.f32.mrb[3].mxu1 }
 0x3df   : > { %v1605_v5 = vadd.f32 %v2312_v0, %v1587_v4 }
 0x3e0   : > { %v1608_v6 = vadd.f32 %v1606_v3, %v1070_v39 }
 0x3e1   : > { %v1607_v7 = vadd.f32 %v1605_v5, %v1069_v40 }
 0x3e2   : > { %v1610_v8 = vmax.f32 %v1608_v6, 0.0 }
 0x3e3   : > { %v1609_v9 = vmax.f32 %v1607_v7, 0.0 }
 0x3e4   : > { %1612 = vst.msk [vmem:[#allocation2 + $0xc] sm:$0xff] %vm441_vm1, %v1610_v8 }
 0x3e5   : > { %1611 = vst.msk [vmem:[#allocation2 + $0x4] sm:$0xff] %vm441_vm1, %v1609_v9 }
 0x3eb   : > { %v1918_v13 = vld [vmem:[#allocation2 + $0xc] sm:$0xf]  ;;  %v2068_v14 = vld [vmem:[#allocation2 + $0x10] sm:$0xf] }
 0x3ec   : > { %v1614_v10 = vld [vmem:[#allocation2 + $0x4] sm:$0xf]  ;;  %v1768_v11 = vld [vmem:[#allocation2 + $0x8] sm:$0xf] }
 0x3ed   : > { %2452 = vmatpush3.msk.msra.mxu0 %vm1619_vm3, %v1614_v10  ;;  %2462 = vmatpush3.msk.msra.mxu1 %vm1619_vm3, %v1768_v11 }
 0x3ee   : > { %2454 = vmatmul.mubr.msk.f32.vlgmr.msra.gmra.mrb[4].mxu0 %vm1615_vm4, %v2541_v12  ;;  %2464 = vmatmul.mubr.msk.f32.vlgmr.msra.gmra.mrb[4].mxu1 %vm1615_vm4, %v2541_v12 }
 0x3ef   : > { %2471 = vmatprep.subr.mxu1 %v2539_v2  ;;  %2473 = vmatprep.mubr.msk.f32.mxu1 %vm2540_vm2, %v2539_v2 }
 0x3f0   : > { %2472 = vmatpush3.msk.msra.mxu1 %vm1619_vm3, %v1918_v13  ;;  %2456 = vmatprep.subr.mxu0 %v2539_v2 }
 0x3f1   : > { %2481 = vmatprep.subr.mxu1 %v2539_v2  ;;  %2458 = vmatprep.mubr.msk.f32.mxu0 %vm2540_vm2, %v2539_v2 }
 0x3f2   : > { %2474 = vmatmul.mubr.msk.f32.vlgmr.msra.gmra.mrb[6].mxu1 %vm1615_vm4, %v2541_v12  ;;  %2457 = vmatpush3.msra.mxu0 %v1693_v15 }
 0x3f3   : > { %2482 = vmatpush3.msk.msra.mxu1 %vm1619_vm3, %v2068_v14  ;;  %2483 = vmatprep.mubr.msk.f32.mxu1 %vm2540_vm2, %v2539_v2 }
 0x3f4   : > { %2466 = vmatprep.subr.mxu0 %v2539_v2 }
 0x3f6   : > { %2484 = vmatmul.mubr.msk.f32.vlgmr.msra.gmra.mrb[8].mxu1 %vm1615_vm4, %v2541_v12 }
 0x4c1   : > { %v1689_v17 = vpop.f32.mrb[4].mxu0  ;;  %v1838_v18 = vpop.f32.mrb[4].mxu1 }
 0x4c2   : > { %2459 = vmatmul.mubr.msk.f32.vlgmr.msra.gmra.mrb[6].mxu0 %vm441_vm1, %v1689_v17  ;;  %v2455_v19 = vpop.f32.mrb[5].mxu0  ;;  %v2465_v20 = vpop.f32.mrb[5].mxu1 }
 0x4c3   : > { %2467 = vmatpush3.msra.mxu0 %v2318_v16  ;;  %2468 = vmatprep.mubr.msk.f32.mxu0 %vm2540_vm2, %v2539_v2 }
 0x4c4   : > { %2476 = vmatprep.subr.mxu0 %v2539_v2 }
 0x4c5   : > { %v1988_v21 = vpop.f32.mrb[6].mxu1 }
 0x4c6   : > { %v2475_v22 = vpop.f32.mrb[7].mxu1 }
 0x4c9   : > { %v2138_v24 = vpop.f32.mrb[8].mxu1 }
 0x4ca   : > { %2469 = vmatmul.mubr.msk.f32.vlgmr.msra.gmra.mrb[6].mxu0 %vm441_vm1, %v1838_v18  ;;  %v2485_v25 = vpop.f32.mrb[9].mxu1 }
 0x4cb   : > { %2477 = vmatpush3.msra.mxu0 %v2322_v23  ;;  %2478 = vmatprep.mubr.msk.f32.mxu0 %vm2540_vm2, %v2539_v2 }
 0x4cc   : > { %2486 = vmatprep.subr.mxu0 %v2539_v2 }
 0x4d2   : > { %2479 = vmatmul.mubr.msk.f32.vlgmr.msra.gmra.mrb[6].mxu0 %vm441_vm1, %v1988_v21 }
 0x4d3   : > { %2487 = vmatpush3.msra.mxu0 %v2326_v26  ;;  %2488 = vmatprep.mubr.msk.f32.mxu0 %vm2540_vm2, %v2539_v2 }
 0x4da   : > { %2489 = vmatmul.mubr.msk.f32.vlgmr.msra.gmra.mrb[6].mxu0 %vm441_vm1, %v2138_v24 }
 0x5ad   : > { %v2213_v28 = vpop.f32.mrb[6].mxu0 }
 0x5ae   : > { %v2495_v29 = vadd.f32 %v2213_v28, %v1613_v27  ;;  %v2490_v30 = vpop.f32.mrb[7].mxu0 }
 0x5b0   : > { %2219 = vst.msk [vmem:[%s436_s17] sm:$0x1] %vm2218_vm5, %v2495_v29 }
 0x5b1 PF: > { %s23_s25 = sadd.s32 1, %s2537_s25  }
 0x5b2   : > { %p20_p4 = scmp.ge.s32.totalorder %s23_s25, 4  }
 0x5b4   :  { %22 = sbr.rel (!%p20_p4) target bundleno = 1 (0x1), region = 113 }

</bundles_post_ra>
